<compile_context>
chip_gen: v7x
topology: tpu7x:2x2x1
jax: 0.10.0
libtpu: 0.0.40
codegen_flags: <defaults>
</compile_context>

<pallas_src>
import jax
import jax.numpy as jnp
from jax.experimental import pallas as pl
from jax.experimental.pallas import tpu as pltpu

# --- small, deterministic hyperparameters consistent with the module ---
VOCAB_SIZE    = 50
EMBEDDING_DIM = 32
N_FILTERS     = 8
FILTER_SIZES  = (2, 3, 4)
OUTPUT_DIM    = 4
SEQ_LEN       = 8
BATCH         = 2
PAD_IDX       = 0                    # accepted by the torch __init__, unused in forward
FS_MAX        = max(FILTER_SIZES)    # 4  -> im2col window width
NGF           = len(FILTER_SIZES) * N_FILTERS   # 24 pooled features


def _cnn_kernel(tok_ref, embblk_ref, wconv_ref, bconv_ref, wfc_ref, bfc_ref,
                probs_ref, classes_ref):
    """Single invocation, whole batch.

    tok_ref    : [B*S, FS_MAX] int32  -- token id of flat position i+k (VOCAB_SIZE = "empty")
    embblk_ref : [FS_MAX*V, FS_MAX*D] f32  -- block-diagonal embedding table
    wconv_ref  : [FS_MAX*D, 3*NF] f32      -- packed conv weights (zero rows for k >= fs)
    bconv_ref  : [1, 3*NF] f32
    wfc_ref    : [3*NF, O] f32             -- fc weight, pre-transposed
    bfc_ref    : [1, O] f32
    probs_ref  : [B, O] f32
    classes_ref: [B, 1] int32
    """
    L, KMAX = tok_ref.shape                  # (B*S, FS_MAX), static
    V, D = VOCAB_SIZE, EMBEDDING_DIM
    S, O, NF = SEQ_LEN, OUTPUT_DIM, N_FILTERS
    B = L // S
    R = KMAX * V                             # one-hot width (4 * 50 = 200)

    tok = tok_ref[...]                       # [L, KMAX] int32

    # ---- fused embedding gather + im2col -------------------------------------
    # one-hot[i, k*V + v] = (tok[i, k] == v); token id == V (pad marker) -> zero row.
    lane = jax.lax.broadcasted_iota(jnp.int32, (L, R), 1)
    match = jnp.zeros((L, R), jnp.bool_)
    for k in range(KMAX):                    # static unroll (4)
        tk = tok[:, k:k + 1]                 # [L, 1]
        in_blk = (lane >= k * V) & (lane < (k + 1) * V)
        match = match | (in_blk & ((lane - k * V) == tk))
    onehot = match.astype(jnp.float32)       # [L, 4*V]

    # xcol[i, k*D + d] = emb[tok[i, k], d]   (zero row for pad marker)
    xcol = jnp.dot(onehot, embblk_ref[...],
                   preferred_element_type=jnp.float32)        # [L, 4*D] = [16, 128]

    # ---- all three conv filter sizes as ONE K=128 matmul ---------------------
    conv = jnp.dot(xcol, wconv_ref[...],
                   preferred_element_type=jnp.float32)        # [L, 3*NF]
    conv = jnp.maximum(conv + bconv_ref[...], 0.0)            # bias + ReLU

    # ---- time-mask invalid positions, max-pool over time per batch element ----
    # Valid conv positions for filter size fs are t <= S - fs.  Masking invalid
    # rows to 0.0 is correct because the max runs over post-ReLU (>= 0) values
    # and every group has at least one valid row.
    t_idx = jax.lax.broadcasted_iota(jnp.int32, (S, NGF), 0)
    c_idx = jax.lax.broadcasted_iota(jnp.int32, (S, NGF), 1)
    valid = jnp.zeros((S, NGF), jnp.bool_)
    for g, fs in enumerate(FILTER_SIZES):    # static unroll (3)
        in_grp = (c_idx >= g * NF) & (c_idx < (g + 1) * NF)
        valid = valid | (in_grp & (t_idx <= S - fs))

    pooled = jnp.concatenate(
        [jnp.max(jnp.where(valid, conv[b * S:(b + 1) * S, :], 0.0),
                 axis=0, keepdims=True) for b in range(B)],
        axis=0)                                               # [B, 3*NF]

    # ---- fc + softmax + argmax (dropout = identity in eval mode) -------------
    # TODO(synk): training-mode dropout (random masking) not implemented.
    logits = jnp.dot(pooled, wfc_ref[...],
                     preferred_element_type=jnp.float32) + bfc_ref[...]   # [B, O]

    m = jnp.max(logits, axis=1, keepdims=True)
    e = jnp.exp(logits - m)
    probs_ref[...] = e / jnp.sum(e, axis=1, keepdims=True)

    # argmax (first max index, matching torch.max(logits, 1)[1])
    idx = jax.lax.broadcasted_iota(jnp.int32, (B, O), 1)
    masked = jnp.where(logits == m, idx, jnp.int32(O))
    classes_ref[...] = jnp.min(masked, axis=1, keepdims=True)


def pack_params(params):
    """Host-side, one-time operand packing (frozen embedding -> block diag,
    conv weights -> single im2col weight, fc weight -> pre-transposed)."""
    V, D, NF = VOCAB_SIZE, EMBEDDING_DIM, N_FILTERS
    emb = params["embedding"].astype(jnp.float32)             # [V, D]

    emb_block = jnp.zeros((FS_MAX * V, FS_MAX * D), jnp.float32)
    for k in range(FS_MAX):
        emb_block = emb_block.at[k * V:(k + 1) * V, k * D:(k + 1) * D].set(emb)

    cols = []
    for g, fs in enumerate(FILTER_SIZES):
        w = params["conv_w"][g]                               # [NF, fs, D]
        wg = jnp.transpose(w, (1, 2, 0)).reshape(fs * D, NF)  # row index = k*D + d
        wg = jnp.concatenate(
            [wg, jnp.zeros(((FS_MAX - fs) * D, NF), jnp.float32)], axis=0)
        cols.append(wg)
    conv_w = jnp.concatenate(cols, axis=1)                    # [FS_MAX*D, 3*NF]
    conv_b = jnp.concatenate(params["conv_b"]).reshape(1, -1)  # [1, 3*NF]

    return {"emb_block": emb_block,
            "conv_w": conv_w,
            "conv_b": conv_b,
            "fc_w_t": jnp.transpose(params["fc_w"]),          # [3*NF, O]
            "fc_b": params["fc_b"].reshape(1, -1)}            # [1, O]


@jax.jit
def cnn_forward(text, packed):
    """text: [seq_len, batch] int32 token ids (same convention as the torch module)."""
    tokens = jnp.transpose(text, (1, 0)).astype(jnp.int32)    # permute(1,0) -> [B, S]
    B, S = tokens.shape
    L = B * S

    # Tiny integer index plumbing: tok_win[i, k] = flat token at position i+k,
    # with VOCAB_SIZE (= "no token") marking the 3 positions past the end.
    # (Windows that spill across batch boundaries only feed masked conv rows
    #  or zero-padded weight rows, so they never affect the result.)
    flat = jnp.concatenate(
        [tokens.reshape(L),
         jnp.full((FS_MAX - 1,), VOCAB_SIZE, jnp.int32)])     # [L + 3]
    tok_win = jnp.stack([flat[k:k + L] for k in range(FS_MAX)], axis=1)  # [L, FS_MAX]

    vmem = pltpu.MemorySpace.VMEM
    probs, classes = pl.pallas_call(
        _cnn_kernel,
        out_shape=(
            jax.ShapeDtypeStruct((B, OUTPUT_DIM), jnp.float32),
            jax.ShapeDtypeStruct((B, 1), jnp.int32),
        ),
        in_specs=[pl.BlockSpec(memory_space=vmem) for _ in range(6)],
        out_specs=(pl.BlockSpec(memory_space=vmem),
                   pl.BlockSpec(memory_space=vmem)),
    )(tok_win, packed["emb_block"], packed["conv_w"], packed["conv_b"],
      packed["fc_w_t"], packed["fc_b"])

    return probs, classes[:, 0]


def init_params(key):
    """Deterministic parameter init mirroring the torch module's shapes."""
    keys = jax.random.split(key, 8)
    # nn.Embedding default: N(0, 1) (frozen in the torch module)
    embedding = jax.random.normal(keys[0], (VOCAB_SIZE, EMBEDDING_DIM), jnp.float32)
    conv_w, conv_b = [], []
    for i, fs in enumerate(FILTER_SIZES):
        # Conv2d(in=1, out=NF, kernel=(fs, D)) weight [NF, 1, fs, D] -> squeeze in-chan
        fan_in = fs * EMBEDDING_DIM
        bound = (1.0 / fan_in) ** 0.5
        conv_w.append(jax.random.uniform(keys[1 + i], (N_FILTERS, fs, EMBEDDING_DIM),
                                         jnp.float32, -bound, bound))
        conv_b.append(jax.random.uniform(keys[4 + i], (N_FILTERS,),
                                         jnp.float32, -bound, bound))
    # fc: xavier_uniform_ weight, bias = 0.01 (init_weights)
    fan_in = len(FILTER_SIZES) * N_FILTERS
    fan_out = OUTPUT_DIM
    limit = (6.0 / (fan_in + fan_out)) ** 0.5
    fc_w = jax.random.uniform(keys[7], (OUTPUT_DIM, fan_in), jnp.float32, -limit, limit)
    fc_b = jnp.full((OUTPUT_DIM,), 0.01, jnp.float32)
    return {"embedding": embedding, "conv_w": conv_w, "conv_b": conv_b,
            "fc_w": fc_w, "fc_b": fc_b}


def _reference_forward(text, params):
    """Pure-JAX reference of the torch forward (eval mode) for sanity checking."""
    emb = params["embedding"][jnp.transpose(text, (1, 0))]      # [B, S, D]
    pooled = []
    for fs, w, b in zip(FILTER_SIZES, params["conv_w"], params["conv_b"]):
        T = SEQ_LEN - fs + 1
        acc = jnp.zeros((emb.shape[0], T, N_FILTERS), jnp.float32)
        for k in range(fs):
            acc = acc + jnp.einsum("btd,fd->btf", emb[:, k:k + T, :], w[:, k, :])
        acc = jnp.maximum(acc + b[None, None, :], 0.0)
        pooled.append(jnp.max(acc, axis=1))
    cat = jnp.concatenate(pooled, axis=1)
    logits = cat @ params["fc_w"].T + params["fc_b"]
    probs = jax.nn.softmax(logits, axis=1)
    return probs, jnp.argmax(logits, axis=1).astype(jnp.int32)


if __name__ == "__main__":
    key = jax.random.PRNGKey(0)
    pkey, tkey = jax.random.split(key)
    params = init_params(pkey)
    packed = pack_params(params)
    # text: [seq_len, batch] int32, same axis convention as the torch module
    text = jax.random.randint(tkey, (SEQ_LEN, BATCH), 0, VOCAB_SIZE, dtype=jnp.int32)

    probs, classes = cnn_forward(text, packed)
    probs = jax.block_until_ready(probs)
    classes = jax.block_until_ready(classes)

    ref_probs, ref_classes = _reference_forward(text, params)
    assert probs.shape == (BATCH, OUTPUT_DIM) and classes.shape == (BATCH,)
    assert jnp.allclose(probs, ref_probs, atol=1e-5, rtol=1e-4)
    assert jnp.array_equal(classes, ref_classes)

    print("KERNEL_OK")
</pallas_src>

<mosaic_0001>
module attributes {stable_mosaic.version = 11 : i64} {
  func.func @_cnn_kernel(%arg0: memref<16x4xi32, #tpu.memory_space<vmem>>, %arg1: memref<200x128xf32, #tpu.memory_space<vmem>>, %arg2: memref<128x24xf32, #tpu.memory_space<vmem>>, %arg3: memref<1x24xf32, #tpu.memory_space<vmem>>, %arg4: memref<24x4xf32, #tpu.memory_space<vmem>>, %arg5: memref<1x4xf32, #tpu.memory_space<vmem>>, %arg6: memref<2x4xf32, #tpu.memory_space<vmem>>, %arg7: memref<2x1xi32, #tpu.memory_space<vmem>>) attributes {dimension_semantics = [], scalar_prefetch = 0 : i64, scratch_operands = 0 : i64, tpu.core_type = #tpu.core_type<tc>} {
    %c0 = arith.constant 0 : index
    %c0_0 = arith.constant 0 : index
    %0 = vector.load %arg0[%c0, %c0_0] : memref<16x4xi32, #tpu.memory_space<vmem>>, vector<16x4xi32>
    %1 = tpu.iota {dimensions = array<i32: 1>} : vector<16x200xi32>
    %false = arith.constant false
    %2 = vector.broadcast %false : i1 to vector<16x200xi1>
    %3 = vector.extract_strided_slice %0 {offsets = [0, 0], sizes = [16, 1], strides = [1, 1]} : vector<16x4xi32> to vector<16x1xi32>
    %c0_i32 = arith.constant 0 : i32
    %4 = vector.broadcast %c0_i32 : i32 to vector<16x200xi32>
    %5 = arith.cmpi sge, %1, %4 : vector<16x200xi32>
    %c50_i32 = arith.constant 50 : i32
    %6 = vector.broadcast %c50_i32 : i32 to vector<16x200xi32>
    %7 = arith.cmpi slt, %1, %6 : vector<16x200xi32>
    %8 = arith.andi %5, %7 : vector<16x200xi1>
    %c0_i32_1 = arith.constant 0 : i32
    %9 = vector.broadcast %c0_i32_1 : i32 to vector<16x200xi32>
    %10 = arith.subi %1, %9 : vector<16x200xi32>
    %11 = vector.broadcast %3 : vector<16x1xi32> to vector<16x200xi32>
    %12 = arith.cmpi eq, %10, %11 : vector<16x200xi32>
    %13 = arith.andi %8, %12 : vector<16x200xi1>
    %14 = arith.ori %2, %13 : vector<16x200xi1>
    %15 = vector.extract_strided_slice %0 {offsets = [0, 1], sizes = [16, 1], strides = [1, 1]} : vector<16x4xi32> to vector<16x1xi32>
    %c50_i32_2 = arith.constant 50 : i32
    %16 = vector.broadcast %c50_i32_2 : i32 to vector<16x200xi32>
    %17 = arith.cmpi sge, %1, %16 : vector<16x200xi32>
    %c100_i32 = arith.constant 100 : i32
    %18 = vector.broadcast %c100_i32 : i32 to vector<16x200xi32>
    %19 = arith.cmpi slt, %1, %18 : vector<16x200xi32>
    %20 = arith.andi %17, %19 : vector<16x200xi1>
    %c50_i32_3 = arith.constant 50 : i32
    %21 = vector.broadcast %c50_i32_3 : i32 to vector<16x200xi32>
    %22 = arith.subi %1, %21 : vector<16x200xi32>
    %23 = vector.broadcast %15 : vector<16x1xi32> to vector<16x200xi32>
    %24 = arith.cmpi eq, %22, %23 : vector<16x200xi32>
    %25 = arith.andi %20, %24 : vector<16x200xi1>
    %26 = arith.ori %14, %25 : vector<16x200xi1>
    %27 = vector.extract_strided_slice %0 {offsets = [0, 2], sizes = [16, 1], strides = [1, 1]} : vector<16x4xi32> to vector<16x1xi32>
    %c100_i32_4 = arith.constant 100 : i32
    %28 = vector.broadcast %c100_i32_4 : i32 to vector<16x200xi32>
    %29 = arith.cmpi sge, %1, %28 : vector<16x200xi32>
    %c150_i32 = arith.constant 150 : i32
    %30 = vector.broadcast %c150_i32 : i32 to vector<16x200xi32>
    %31 = arith.cmpi slt, %1, %30 : vector<16x200xi32>
    %32 = arith.andi %29, %31 : vector<16x200xi1>
    %c100_i32_5 = arith.constant 100 : i32
    %33 = vector.broadcast %c100_i32_5 : i32 to vector<16x200xi32>
    %34 = arith.subi %1, %33 : vector<16x200xi32>
    %35 = vector.broadcast %27 : vector<16x1xi32> to vector<16x200xi32>
    %36 = arith.cmpi eq, %34, %35 : vector<16x200xi32>
    %37 = arith.andi %32, %36 : vector<16x200xi1>
    %38 = arith.ori %26, %37 : vector<16x200xi1>
    %39 = vector.extract_strided_slice %0 {offsets = [0, 3], sizes = [16, 1], strides = [1, 1]} : vector<16x4xi32> to vector<16x1xi32>
    %c150_i32_6 = arith.constant 150 : i32
    %40 = vector.broadcast %c150_i32_6 : i32 to vector<16x200xi32>
    %41 = arith.cmpi sge, %1, %40 : vector<16x200xi32>
    %c200_i32 = arith.constant 200 : i32
    %42 = vector.broadcast %c200_i32 : i32 to vector<16x200xi32>
    %43 = arith.cmpi slt, %1, %42 : vector<16x200xi32>
    %44 = arith.andi %41, %43 : vector<16x200xi1>
    %c150_i32_7 = arith.constant 150 : i32
    %45 = vector.broadcast %c150_i32_7 : i32 to vector<16x200xi32>
    %46 = arith.subi %1, %45 : vector<16x200xi32>
    %47 = vector.broadcast %39 : vector<16x1xi32> to vector<16x200xi32>
    %48 = arith.cmpi eq, %46, %47 : vector<16x200xi32>
    %49 = arith.andi %44, %48 : vector<16x200xi1>
    %50 = arith.ori %38, %49 : vector<16x200xi1>
    %51 = arith.extui %50 : vector<16x200xi1> to vector<16x200xi32>
    %52 = arith.sitofp %51 : vector<16x200xi32> to vector<16x200xf32>
    %c0_8 = arith.constant 0 : index
    %c0_9 = arith.constant 0 : index
    %53 = vector.load %arg1[%c0_8, %c0_9] : memref<200x128xf32, #tpu.memory_space<vmem>>, vector<200x128xf32>
    %cst = arith.constant dense<0.000000e+00> : vector<16x128xf32>
    %54 = tpu.matmul %52, %53, %cst {dimension_numbers = #tpu.dot_dimension_numbers<[1], [0], [0], [1], [0, 0, 1, 1], [], []>} : vector<16x200xf32>, vector<200x128xf32>, vector<16x128xf32> -> vector<16x128xf32>
    %c0_10 = arith.constant 0 : index
    %c0_11 = arith.constant 0 : index
    %55 = vector.load %arg2[%c0_10, %c0_11] : memref<128x24xf32, #tpu.memory_space<vmem>>, vector<128x24xf32>
    %cst_12 = arith.constant dense<0.000000e+00> : vector<16x24xf32>
    %56 = tpu.matmul %54, %55, %cst_12 {dimension_numbers = #tpu.dot_dimension_numbers<[1], [0], [0], [1], [0, 0, 1, 1], [], []>} : vector<16x128xf32>, vector<128x24xf32>, vector<16x24xf32> -> vector<16x24xf32>
    %c0_13 = arith.constant 0 : index
    %c0_14 = arith.constant 0 : index
    %57 = vector.load %arg3[%c0_13, %c0_14] : memref<1x24xf32, #tpu.memory_space<vmem>>, vector<1x24xf32>
    %58 = vector.broadcast %57 : vector<1x24xf32> to vector<16x24xf32>
    %59 = arith.addf %56, %58 : vector<16x24xf32>
    %cst_15 = arith.constant 0.000000e+00 : f32
    %60 = vector.broadcast %cst_15 : f32 to vector<16x24xf32>
    %61 = arith.maximumf %59, %60 : vector<16x24xf32>
    %62 = tpu.iota {dimensions = array<i32: 0>} : vector<8x24xi32>
    %63 = tpu.iota {dimensions = array<i32: 1>} : vector<8x24xi32>
    %false_16 = arith.constant false
    %64 = vector.broadcast %false_16 : i1 to vector<8x24xi1>
    %c0_i32_17 = arith.constant 0 : i32
    %65 = vector.broadcast %c0_i32_17 : i32 to vector<8x24xi32>
    %66 = arith.cmpi sge, %63, %65 : vector<8x24xi32>
    %c8_i32 = arith.constant 8 : i32
    %67 = vector.broadcast %c8_i32 : i32 to vector<8x24xi32>
    %68 = arith.cmpi slt, %63, %67 : vector<8x24xi32>
    %69 = arith.andi %66, %68 : vector<8x24xi1>
    %c6_i32 = arith.constant 6 : i32
    %70 = vector.broadcast %c6_i32 : i32 to vector<8x24xi32>
    %71 = arith.cmpi sle, %62, %70 : vector<8x24xi32>
    %72 = arith.andi %69, %71 : vector<8x24xi1>
    %73 = arith.ori %64, %72 : vector<8x24xi1>
    %c8_i32_18 = arith.constant 8 : i32
    %74 = vector.broadcast %c8_i32_18 : i32 to vector<8x24xi32>
    %75 = arith.cmpi sge, %63, %74 : vector<8x24xi32>
    %c16_i32 = arith.constant 16 : i32
    %76 = vector.broadcast %c16_i32 : i32 to vector<8x24xi32>
    %77 = arith.cmpi slt, %63, %76 : vector<8x24xi32>
    %78 = arith.andi %75, %77 : vector<8x24xi1>
    %c5_i32 = arith.constant 5 : i32
    %79 = vector.broadcast %c5_i32 : i32 to vector<8x24xi32>
    %80 = arith.cmpi sle, %62, %79 : vector<8x24xi32>
    %81 = arith.andi %78, %80 : vector<8x24xi1>
    %82 = arith.ori %73, %81 : vector<8x24xi1>
    %c16_i32_19 = arith.constant 16 : i32
    %83 = vector.broadcast %c16_i32_19 : i32 to vector<8x24xi32>
    %84 = arith.cmpi sge, %63, %83 : vector<8x24xi32>
    %c24_i32 = arith.constant 24 : i32
    %85 = vector.broadcast %c24_i32 : i32 to vector<8x24xi32>
    %86 = arith.cmpi slt, %63, %85 : vector<8x24xi32>
    %87 = arith.andi %84, %86 : vector<8x24xi1>
    %c4_i32 = arith.constant 4 : i32
    %88 = vector.broadcast %c4_i32 : i32 to vector<8x24xi32>
    %89 = arith.cmpi sle, %62, %88 : vector<8x24xi32>
    %90 = arith.andi %87, %89 : vector<8x24xi1>
    %91 = arith.ori %82, %90 : vector<8x24xi1>
    %92 = vector.extract_strided_slice %61 {offsets = [0, 0], sizes = [8, 24], strides = [1, 1]} : vector<16x24xf32> to vector<8x24xf32>
    %cst_20 = arith.constant 0.000000e+00 : f32
    %93 = vector.broadcast %cst_20 : f32 to vector<8x24xf32>
    %94 = arith.select %91, %92, %93 : vector<8x24xi1>, vector<8x24xf32>
    %cst_21 = arith.constant dense<0xFF800000> : vector<24xf32>
    %95 = vector.multi_reduction <maximumf>, %94, %cst_21 [0] : vector<8x24xf32> to vector<24xf32>
    %96 = vector.shape_cast %95 : vector<24xf32> to vector<1x24xf32>
    %97 = vector.extract_strided_slice %61 {offsets = [8, 0], sizes = [8, 24], strides = [1, 1]} : vector<16x24xf32> to vector<8x24xf32>
    %cst_22 = arith.constant 0.000000e+00 : f32
    %98 = vector.broadcast %cst_22 : f32 to vector<8x24xf32>
    %99 = arith.select %91, %97, %98 : vector<8x24xi1>, vector<8x24xf32>
    %cst_23 = arith.constant dense<0xFF800000> : vector<24xf32>
    %100 = vector.multi_reduction <maximumf>, %99, %cst_23 [0] : vector<8x24xf32> to vector<24xf32>
    %101 = vector.shape_cast %100 : vector<24xf32> to vector<1x24xf32>
    %102 = tpu.concatenate %96, %101 in 0 : vector<1x24xf32>, vector<1x24xf32> -> vector<2x24xf32>
    %c0_24 = arith.constant 0 : index
    %c0_25 = arith.constant 0 : index
    %103 = vector.load %arg4[%c0_24, %c0_25] : memref<24x4xf32, #tpu.memory_space<vmem>>, vector<24x4xf32>
    %cst_26 = arith.constant dense<0.000000e+00> : vector<2x4xf32>
    %104 = tpu.matmul %102, %103, %cst_26 {dimension_numbers = #tpu.dot_dimension_numbers<[1], [0], [0], [1], [0, 0, 1, 1], [], []>} : vector<2x24xf32>, vector<24x4xf32>, vector<2x4xf32> -> vector<2x4xf32>
    %c0_27 = arith.constant 0 : index
    %c0_28 = arith.constant 0 : index
    %105 = vector.load %arg5[%c0_27, %c0_28] : memref<1x4xf32, #tpu.memory_space<vmem>>, vector<1x4xf32>
    %106 = vector.broadcast %105 : vector<1x4xf32> to vector<2x4xf32>
    %107 = arith.addf %104, %106 : vector<2x4xf32>
    %cst_29 = arith.constant dense<0xFF800000> : vector<2xf32>
    %108 = vector.multi_reduction <maximumf>, %107, %cst_29 [1] : vector<2x4xf32> to vector<2xf32>
    %109 = vector.shape_cast %108 : vector<2xf32> to vector<2x1xf32>
    %110 = vector.broadcast %109 : vector<2x1xf32> to vector<2x4xf32>
    %111 = arith.subf %107, %110 : vector<2x4xf32>
    %112 = math.exp %111 : vector<2x4xf32>
    %cst_30 = arith.constant dense<0.000000e+00> : vector<2xf32>
    %113 = vector.multi_reduction <add>, %112, %cst_30 [1] : vector<2x4xf32> to vector<2xf32>
    %114 = vector.shape_cast %113 : vector<2xf32> to vector<2x1xf32>
    %115 = vector.broadcast %114 : vector<2x1xf32> to vector<2x4xf32>
    %116 = arith.divf %112, %115 : vector<2x4xf32>
    %c0_31 = arith.constant 0 : index
    %c0_32 = arith.constant 0 : index
    %117 = vector.load %arg6[%c0_31, %c0_32] : memref<2x4xf32, #tpu.memory_space<vmem>>, vector<2x4xf32>
    tpu.vector_store %arg6[%c0_31, %c0_32], %116 {strides = array<i32>} : memref<2x4xf32, #tpu.memory_space<vmem>>, vector<2x4xf32>,
    %118 = tpu.iota {dimensions = array<i32: 1>} : vector<2x4xi32>
    %119 = vector.broadcast %109 : vector<2x1xf32> to vector<2x4xf32>
    %120 = arith.cmpf oeq, %107, %119 : vector<2x4xf32>
    %c4_i32_33 = arith.constant 4 : i32
    %121 = vector.broadcast %c4_i32_33 : i32 to vector<2x4xi32>
    %122 = arith.select %120, %118, %121 : vector<2x4xi1>, vector<2x4xi32>
    %cst_34 = arith.constant dense<2147483647> : vector<2xi32>
    %123 = vector.multi_reduction <minsi>, %122, %cst_34 [1] : vector<2x4xi32> to vector<2xi32>
    %124 = vector.shape_cast %123 : vector<2xi32> to vector<2x1xi32>
    %c0_35 = arith.constant 0 : index
    %c0_36 = arith.constant 0 : index
    %125 = vector.load %arg7[%c0_35, %c0_36] : memref<2x1xi32, #tpu.memory_space<vmem>>, vector<2x1xi32>
    tpu.vector_store %arg7[%c0_35, %c0_36], %124 {strides = array<i32>} : memref<2x1xi32, #tpu.memory_space<vmem>>, vector<2x1xi32>,
    return
  }
}

</mosaic_0001>

<bundles_post_ra>
// kernel: cnn_forward.1
= control target key start
LH: loop header
LB: loop body
LE: loop exit
PB: predicated region body
PF: predicated region fallthrough
CT: control target
= control target key end

     0   :  { %v709_v1 = vmov 2   ;;  %v710_v2 = vmov 0   ;;  %v711_v8 = vmov 0.0|0.0   ;;  %v712_v12 = vmov 3   ;;  %s1014_s0 = inlined_call_operand.vmem [shape: s32[16,4], index: 0, kind: input, shape index: {}]   ;;  %s1015_s1 = inlined_call_operand.vmem [shape: f32[200,128], index: 1, kind: input, shape index: {}]   ;;  %s1016_s2 = inlined_call_operand.vmem [shape: f32[128,24], index: 2, kind: input, shape index: {}]   ;;  %s1017_s3 = inlined_call_operand.vmem [shape: f32[1,24], index: 3, kind: input, shape index: {}]   ;;  %s1018_s4 = inlined_call_operand.vmem [shape: f32[24,4], index: 4, kind: input, shape index: {}]   ;;  %s1019_s5 = inlined_call_operand.vmem [shape: f32[1,4], index: 5, kind: input, shape index: {}]   ;;  %s1020_s6 = inlined_call_operand.hbm [shape: f32[2,4], index: 6, kind: output, shape index: {0}]   ;;  %s1021_s7 = inlined_call_operand.vmem [shape: s32[2,1], index: 7, kind: output, shape index: {1}]  }
   0x1   :  { %v26_v0 = vld [vmem:[%s1014_s0] sm:$0xff]  ;;  %676 = vset.pattern.permute.xlu1 %v709_v1  ;;  %674 = vset.pattern.permute.xlu0 %v710_v2  ;;  %v138_v4 = vld [vmem:[%s1015_s1 + $0x8] sm:$0xff]  ;;  %v139_v5 = vld [vmem:[%s1015_s1 + $0x10] sm:$0xff]  ;;  %v713_v13 = vmov 1  }
   0x2   :  { %v137_v3 = vld [vmem:[%s1015_s1] sm:$0xff]  ;;  %86 = vperm.xlu1 %676, %v26_v0   ;;  %38 = vperm.xlu0 %674, %v26_v0   ;;  %v140_v7 = vld [vmem:[%s1015_s1 + $0x18] sm:$0xff]  ;;  %v142_v11 = vld [vmem:[%s1015_s1 + $0x28] sm:$0xff] }
   0x3   :  { %v596_v6 = vpack.c.bf16 %v138_v4, %v137_v3  ;;  %595 = vmatprep.subr.bf16.mxu0 %v711_v8  ;;  %v599_v9 = vpack.c.bf16 %v140_v7, %v139_v5  ;;  %v141_v10 = vld [vmem:[%s1015_s1 + $0x20] sm:$0xff]  ;;  %v27_v14 = vld [vmem:[%s1014_s0 + $0x8] sm:$0xff]  ;;  %v143_v16 = vld [vmem:[%s1015_s1 + $0x30] sm:$0xff] }
   0x4   :  { %v602_v15 = vpack.c.bf16 %v142_v11, %v141_v10  ;;  %v144_v17 = vld [vmem:[%s1015_s1 + $0x38] sm:$0xff] }
   0x5   :  { %597 = vmatpush1.bf16.msra.mxu0 %v596_v6 }
   0x6   :  { %598 = vmatprep.subr.bf16.mxu0 %v711_v8  ;;  %677 = vset.pattern.permute.xlu1 %v712_v12 }
   0x7   :  { %675 = vset.pattern.permute.xlu0 %v713_v13  ;;  %112 = vperm.xlu1 %677, %v26_v0  }
   0x8   :  { %60 = vperm.xlu0 %675, %v26_v0  }
   0x9   :  { %600 = vmatpush1.bf16.msra.mxu0 %v599_v9 }
   0xa   :  { %601 = vmatprep.subr.bf16.mxu0 %v711_v8 }
   0xb   :  { %678 = vset.pattern.permute.xlu1 %v710_v2 }
   0xc   :  { %63 = vperm.xlu0 %675, %v27_v14  }
   0xd   :  { %13 = vsyncpa [#allocation3], 0  ;;  %41 = vperm.xlu1 %678, %v27_v14   ;;  %603 = vmatpush1.bf16.msra.mxu0 %v602_v15  ;;  %v605_v18 = vpack.c.bf16 %v144_v17, %v143_v16  ;;  %v145_v19 = vld [vmem:[%s1015_s1 + $0x40] sm:$0xff]  ;;  %v146_v20 = vld [vmem:[%s1015_s1 + $0x48] sm:$0xff]  ;;  %v714_v61 = vmov 0.0   ;;  %v28_v63 = vlaneseq }
   0xe   :  { %604 = vmatprep.subr.bf16.mxu0 %v711_v8  ;;  %v608_v21 = vpack.c.bf16 %v146_v20, %v145_v19  ;;  %v147_v22 = vld [vmem:[%s1015_s1 + $0x50] sm:$0xff]  ;;  %v148_v23 = vld [vmem:[%s1015_s1 + $0x58] sm:$0xff]  ;;  %v149_v25 = vld [vmem:[%s1015_s1 + $0x60] sm:$0xff] }
   0xf   :  { %v611_v24 = vpack.c.bf16 %v148_v23, %v147_v22  ;;  %v150_v26 = vld [vmem:[%s1015_s1 + $0x68] sm:$0xff]  ;;  %v244_v27 = vld [vmem:[%s1016_s2] sm:$0xff]  ;;  %v246_v29 = vld [vmem:[%s1016_s2 + $0x10] sm:$0xff]  ;;  %v888_v0 = vand.u32 127, %v28_v63 }
  0x10   :  { %680 = vset.pattern.permute.xlu0 %v712_v12  ;;  %v245_v28 = vld [vmem:[%s1016_s2 + $0x8] sm:$0xff]  ;;  %v247_v31 = vld [vmem:[%s1016_s2 + $0x18] sm:$0xff]  ;;  %v614_v32 = vpack.c.bf16 %v150_v26, %v149_v25  ;;  %v248_v34 = vld [vmem:[%s1016_s2 + $0x20] sm:$0xff] }
  0x11   :  { %679 = vset.pattern.permute.xlu1 %v709_v1  ;;  %115 = vperm.xlu0 %680, %v27_v14   ;;  %v631_v30 = vpack.c.bf16 %v245_v28, %v244_v27  ;;  %v635_v33 = vpack.c.bf16 %v247_v31, %v246_v29  ;;  %v249_v35 = vld [vmem:[%s1016_s2 + $0x28] sm:$0xff]  ;;  %v151_v36 = vld [vmem:[%s1015_s1 + $0x70] sm:$0xff]  ;;  %v152_v37 = vld [vmem:[%s1015_s1 + $0x78] sm:$0xff]  ;;  %v30_v1 = vadd.s32 128, %v888_v0  ;;  %vm51_vm2 = vcmp.ge.s32.totalorder %v888_v0, 50 }
  0x12   :  { %89 = vperm.xlu1 %679, %v27_v14   ;;  %606 = vmatpush1.bf16.msra.mxu0 %v605_v18  ;;  %v639_v38 = vpack.c.bf16 %v249_v35, %v248_v34  ;;  %v617_v39 = vpack.c.bf16 %v152_v37, %v151_v36  ;;  %v250_v40 = vld [vmem:[%s1016_s2 + $0x30] sm:$0xff]  ;;  %v251_v41 = vld [vmem:[%s1016_s2 + $0x38] sm:$0xff]  ;;  %v153_v42 = vld [vmem:[%s1015_s1 + $0x80] sm:$0xff]  ;;  %vm53_vm3 = vcmp.lt.s32.totalorder %v888_v0, 100  ;;  %vm33_vm4 = vcmp.lt.s32.totalorder %v888_v0, 50 }
  0x13   :  { %607 = vmatprep.subr.bf16.mxu0 %v711_v8  ;;  %632 = vmatprep.subr.bf16.mxu1 %v631_v30  ;;  %v154_v43 = vld [vmem:[%s1015_s1 + $0x88] sm:$0xff]  ;;  %v643_v44 = vpack.c.bf16 %v251_v41, %v250_v40  ;;  %v252_v46 = vld [vmem:[%s1016_s2 + $0x40] sm:$0xff]  ;;  %v155_v48 = vld [vmem:[%s1015_s1 + $0x90] sm:$0xff]  ;;  %v517_v2 = vadd.s32 4294967196, %v30_v1  ;;  %vm104_vm0 = vcmp.ge.s32.totalorder %v30_v1, 150  ;;  %vm106_vm1 = vcmp.lt.s32.totalorder %v30_v1, 200 }
  0x14   :  { %634 = vmatpush3.bf16.msra.mxu1 %v631_v30  ;;  %v620_v45 = vpack.c.bf16 %v154_v43, %v153_v42  ;;  %v253_v47 = vld [vmem:[%s1016_s2 + $0x48] sm:$0xff]  ;;  %v156_v49 = vld [vmem:[%s1015_s1 + $0x98] sm:$0xff]  ;;  %v254_v52 = vld [vmem:[%s1016_s2 + $0x50] sm:$0xff]  ;;  %v519_v5 = vadd.s32 4294967146, %v30_v1  ;;  %v514_v6 = vadd.s32 4294967246, %v888_v0  ;;  %vm80_vm8 = vcmp.lt.s32.totalorder %v30_v1, 150 }
  0x15   :  { %636 = vmatprep.subr.bf16.mxu1 %v635_v33  ;;  %v647_v50 = vpack.c.bf16 %v253_v47, %v252_v46  ;;  %v623_v51 = vpack.c.bf16 %v156_v49, %v155_v48  ;;  %v255_v53 = vld [vmem:[%s1016_s2 + $0x58] sm:$0xff]  ;;  %v157_v54 = vld [vmem:[%s1015_s1 + $0xa0] sm:$0xff]  ;;  %v158_v55 = vld [vmem:[%s1015_s1 + $0xa8] sm:$0xff]  ;;  %v516_v13 = vadd.s32 4294967196, %v888_v0 }
  0x16   :  { %609 = vmatpush1.bf16.msra.mxu0 %v608_v21  ;;  %v651_v56 = vpack.c.bf16 %v255_v53, %v254_v52  ;;  %v626_v57 = vpack.c.bf16 %v158_v55, %v157_v54  ;;  %v159_v58 = vld [vmem:[%s1015_s1 + $0xb0] sm:$0xff]  ;;  %v160_v59 = vld [vmem:[%s1015_s1 + $0xb8] sm:$0xff]  ;;  %v161_v62 = vld [vmem:[%s1015_s1 + $0xc0] sm:$0xff] }
  0x17   :  { %610 = vmatprep.subr.bf16.mxu0 %v711_v8  ;;  %v629_v60 = vpack.c.bf16 %v160_v59, %v159_v58  ;;  %vm896_vm7 = vmand %vm104_vm0, %vm106_vm1  ;;  %vm162_vm1 = vcmask 588800   ;;  %v256_v25 = vld [vmem:[%s1016_s2 + $0x60] sm:$0xff]  ;;  %v257_v26 = vld [vmem:[%s1016_s2 + $0x68] sm:$0xff] }
  0x18   :  { %638 = vmatpush3.bf16.msra.mxu1 %v635_v33  ;;  %vm900_vm9 = vmand %vm51_vm2, %vm53_vm3  ;;  %vm77_vm2 = vcmp.ge.s32.totalorder %v888_v0, 100  ;;  %v655_v27 = vpack.c.bf16 %v257_v26, %v256_v25  ;;  %v258_v28 = vld [vmem:[%s1016_s2 + $0x70] sm:$0xff]  ;;  %v259_v29 = vld [vmem:[%s1016_s2 + $0x78] sm:$0xff] }
  0x19   :  { %640 = vmatprep.subr.bf16.mxu1 %v639_v38  ;;  %v659_v30 = vpack.c.bf16 %v259_v29, %v258_v28  ;;  %v381_v35 = vld [vmem:[%s1018_s4] sm:$0xff]  ;;  %v382_v36 = vld [vmem:[%s1018_s4 + $0x8] sm:$0xff] }
  0x1a   :  { %612 = vmatpush1.bf16.msra.mxu0 %v611_v24  ;;  %v664_v37 = vpack.c.bf16 %v382_v36, %v381_v35 }
  0x1b   :  { %613 = vmatprep.subr.bf16.mxu0 %v711_v8 }
  0x1c   :  { %642 = vmatpush3.bf16.msra.mxu1 %v639_v38  ;;  %v345_v38 = vshrl.u32 %v28_v63, 7  ;;  %v527_v63 = vld [vmem:[%s1019_s5] ss:$0 sm:$0xff]  ;;  %s716_s5 = smov [#allocation2]  }
  0x1d   :  { %644 = vmatprep.subr.bf16.mxu1 %v643_v44  ;;  %s502_s0 = sshll.u32 %s716_s5, 4  ;;  %s503_s0 = int_to_ptr.vmem [resolvable:$true] %s502_s0 }
  0x1e   :  { %615 = vmatpush1.bf16.msra.mxu0 %v614_v32  ;;  %s685_s21 = scalar_lea.vmem %s503_s0, 32  ;;  %p690_p1 = scmp.lt.s32.totalorder %s503_s0, %s503_s0 }
  0x1f   :  { %616 = vmatprep.subr.bf16.mxu0 %v711_v8  ;;  %p686_p0 = scmp.ne.s32.totalorder %s503_s0, %s685_s21  ;;  %p691_p2 = scmp.lt.s32.totalorder %s685_s21, %s685_s21 }
  0x20   :  { %646 = vmatpush3.bf16.msra.mxu1 %v643_v44 }
  0x21   :  { %648 = vmatprep.subr.bf16.mxu1 %v647_v50  ;;  %p692_p3 = por %p691_p2, %p690_p1 }
  0x22   :  { %618 = vmatpush1.bf16.msra.mxu0 %v617_v39  ;;  %v526_v39 = vld [vmem:[%s1017_s3] ss:$0 sm:$0xff] }
  0x23   :  { %619 = vmatprep.subr.bf16.mxu0 %v711_v8  ;;  %p693_p4 = pnand %p692_p3, %p686_p0 }
  0x24   :  { %650 = vmatpush3.bf16.msra.mxu1 %v647_v50 }
  0x25   :  { %652 = vmatprep.subr.bf16.mxu1 %v651_v56 }
  0x26   :  { %621 = vmatpush1.bf16.msra.mxu0 %v620_v45 }
  0x27   :  { %622 = vmatprep.subr.bf16.mxu0 %v711_v8 }
  0x28   :  { %654 = vmatpush3.bf16.msra.mxu1 %v651_v56 }
  0x29   :  { %656 = vmatprep.subr.bf16.mxu1 %v655_v27 }
  0x2a   :  { %624 = vmatpush1.bf16.msra.mxu0 %v623_v51 }
  0x2b   :  { %625 = vmatprep.subr.bf16.mxu0 %v711_v8 }
  0x2c   :  { %658 = vmatpush3.bf16.msra.mxu1 %v655_v27 }
  0x2d   :  { %660 = vmatprep.subr.bf16.mxu1 %v659_v30 }
  0x2e   :  { %627 = vmatpush1.bf16.msra.mxu0 %v626_v57 }
  0x2f   :  { %628 = vmatprep.subr.bf16.mxu0 %v711_v8 }
  0x30   :  { %662 = vmatpush3.bf16.msra.mxu1 %v659_v30 }
  0x31   :  { %663 = vmatprep.subr.bf16.mxu1 %v711_v8  ;;  %v383_v8 = vld [vmem:[%s1018_s4 + $0x10] sm:$0xff] }
  0x32   :  { %630 = vmatpush1.bf16.msra.mxu0 %v629_v60 }
  0x33   :  { %217 = vmatprep.subr.mxu0 %v714_v61 }
  0x36   :  { %218 = vmatpush1.msra.mxu0 %v161_v62 }
  0x81   :  { %v87_v3 = vpop.permute.xlu1 %86  ;;  %v39_v4 = vpop.permute.xlu0 %38 }
  0x82   :  { %vm43_vm5 = vcmp.eq.s32.totalorder %v888_v0, %v39_v4  ;;  %vm92_vm6 = vcmp.eq.s32.totalorder %v517_v2, %v87_v3  ;;  %vm91_vm3 = vcmp.eq.s32.totalorder %v516_v13, %v87_v3 }
  0x83   :  { %vm906_vm10 = vmand %vm33_vm4, %vm43_vm5 }
  0x84   :  { %vm96_vm13 = vmand %vm80_vm8, %vm92_vm6 }
  0x86   :  { %v113_v11 = vpop.permute.xlu1 %112 }
  0x87   :  { %v61_v12 = vpop.permute.xlu0 %60  ;;  %vm118_vm11 = vcmp.eq.s32.totalorder %v519_v5, %v113_v11 }
  0x88   :  { %vm65_vm12 = vcmp.eq.s32.totalorder %v514_v6, %v61_v12  ;;  %vm122_vm14 = vmand %vm896_vm7, %vm118_vm11 }
  0x89   :  { %vm916_vm15 = vmand %vm900_vm9, %vm65_vm12 }
  0x8a   :  { %vm73_vm0 = vmor %vm906_vm10, %vm916_vm15 }
  0x8b   :  { %v64_v15 = vpop.permute.xlu0 %63  ;;  %vm126_vm6 = vmor %vm96_vm13, %vm122_vm14 }
  0x8c   :  { %vm67_vm5 = vcmp.eq.s32.totalorder %v514_v6, %v64_v15  ;;  %v42_v16 = vpop.permute.xlu1 %41  ;;  %v521_v18 = vsel %vm126_vm6, 1.0, %v714_v61  ;;  %vm95_vm13 = vmand %vm77_vm2, %vm91_vm3 }
  0x8d   :  { %vm927_vm11 = vmand %vm900_vm9, %vm67_vm5  ;;  %vm45_vm12 = vcmp.eq.s32.totalorder %v888_v0, %v42_v16  ;;  %524 = vmatprep.mubr.msk.f32.mxu0 %vm162_vm1, %v521_v18 }
  0x8e   :  { %vm936_vm10 = vmand %vm33_vm4, %vm45_vm12 }
  0x8f   :  { %vm99_vm14 = vmor %vm73_vm0, %vm95_vm13 }
  0x90   :  { %v116_v20 = vpop.permute.xlu0 %115  ;;  %vm75_vm9 = vmor %vm936_vm10, %vm927_vm11  ;;  %v520_v21 = vsel %vm99_vm14, 1.0, %v714_v61  ;;  %vm348_vm11 = vcmp.le.s32.totalorder %v345_v38, 6  ;;  %vm353_vm14 = vcmp.le.s32.totalorder %v345_v38, 5 }
  0x91   :  { %v90_v22 = vpop.permute.xlu1 %89  ;;  %vm120_vm15 = vcmp.eq.s32.totalorder %v519_v5, %v116_v20  ;;  %234 = vmatmul.mubr.f32.vlgmr.msra.gmra.mrb[0].mxu0 %v520_v21 }
  0x92   :  { %vm93_vm5 = vcmp.eq.s32.totalorder %v516_v13, %v90_v22  ;;  %vm94_vm4 = vcmp.eq.s32.totalorder %v517_v2, %v90_v22  ;;  %vm124_vm6 = vmand %vm896_vm7, %vm120_vm15  ;;  %vm715_vm7 = vmmov 0   ;;  %vm357_vm15 = vcmp.lt.s32.totalorder %v888_v0, 24 }
  0x93   :  { %vm97_vm3 = vmand %vm77_vm2, %vm93_vm5  ;;  %vm346_vm2 = vcmp.lt.s32.totalorder %v888_v0, 8 }
  0x94   :  { %vm98_vm0 = vmand %vm80_vm8, %vm94_vm4  ;;  %vm350_vm8 = vcmp.ge.s32.totalorder %v888_v0, 8 }
  0x95   :  { %vm128_vm12 = vmor %vm98_vm0, %vm124_vm6 }
  0x96   :  { %v523_v23 = vsel %vm128_vm12, 1.0, %v714_v61  ;;  %vm101_vm13 = vmor %vm75_vm9, %vm97_vm3  ;;  %vm356_vm9 = vcmp.ge.s32.totalorder %v888_v0, 16  ;;  %vm359_vm3 = vcmp.le.s32.totalorder %v345_v38, 4 }
  0x97   :  { %525 = vmatprep.mubr.msk.f32.mxu0 %vm162_vm1, %v523_v23  ;;  %v522_v24 = vsel %vm101_vm13, 1.0, %v714_v61  ;;  %vm351_vm1 = vcmp.lt.s32.totalorder %v888_v0, 16  ;;  %vm349_vm5 = vmand %vm346_vm2, %vm348_vm11 }
  0x98   :  { %239 = vmatmul.mubr.f32.gmra.mrb[2].mxu0 %v522_v24  ;;  %vm352_vm10 = vmand %vm350_vm8, %vm351_vm1  ;;  %vm379_vm8 = vcmask 1040384   ;;  %vm464_vm1 = vcmask 25600  }
  0x99   :  { %vm354_vm4 = vmand %vm352_vm10, %vm353_vm14 }
  0x9a   :  { %vm358_vm6 = vmand %vm356_vm9, %vm357_vm15 }
  0x9b   :  { %vm355_vm0 = vmor %vm349_vm5, %vm354_vm4 }
  0x9c   :  { %vm360_vm12 = vmand %vm358_vm6, %vm359_vm3 }
  0x9d   :  { %vm361_vm13 = vmor %vm355_vm0, %vm360_vm12 }
 0x164   :  { %v235_v31 = vpop.f32.mrb[0].mxu0 }
 0x165   :  { %v237_v32 = vpop.f32.mrb[1].mxu0  ;;  %583 = vmatprep.mubr.f32.mxu1 %v235_v31 }
 0x16b   :  { %v240_v33 = vpop.f32.mrb[2].mxu0 }
 0x16c   :  { %v242_v34 = vpop.f32.mrb[3].mxu0  ;;  %584 = vmatmul.mubr.f32.vlgmr.msra.gmra.mrb[0].mxu1 %v240_v33 }
 0x16d   :  { %592 = vmatprep.mubr.msk.f32.mxu1 %vm715_vm7, %v714_v61  ;;  %665 = vmatpush3.bf16.msra.mxu1 %v664_v37  ;;  %vm363_vm7 = vcmask 195584  }
 0x16e   :  { %590 = vmatprep.subr.mxu1 %v714_v61 }
 0x171   :  { %591 = vmatpush3.msra.mxu1 %v383_v8 }
 0x23f   :  { %v585_v40 = vpop.f32.mrb[0].mxu1 }
 0x240   :  { %v339_v41 = vadd.f32 %v585_v40, %v526_v39  ;;  %v333_v42 = vpop.f32.mrb[1].mxu1 }
 0x241   :  { %v334_v43 = vadd.f32 %v526_v39, %v333_v42 }
 0x242   :  { %v343_v44 = vmax.f32 %v339_v41, 0.0 }
 0x243   :  { %v342_v45 = vmax.f32 %v334_v43, 0.0 }
 0x244   :  { %v371_v46 = vsel %vm361_vm13, %v343_v44, 0.0 }
 0x245   :  { %v372_v47 = vsel %vm363_vm7, %v371_v46, -inf  ;;  %v362_v48 = vsel %vm361_vm13, %v342_v45, 0.0 }
 0x246   :  { %v373_v49 = vrot.slane %v372_v47, 4  ;;  %v364_v50 = vsel %vm363_vm7, %v362_v48, -inf }
 0x247   :  { %v365_v51 = vrot.slane %v364_v50, 4 }
 0x248   :  { %v374_v52 = vmax.f32 %v372_v47, %v373_v49 }
 0x249   :  { %v366_v53 = vmax.f32 %v364_v50, %v365_v51 }
 0x24a   :  { %v375_v54 = vrot.slane %v374_v52, 2 }
 0x24b   :  { %v367_v55 = vrot.slane %v366_v53, 2 }
 0x24c   :  { %v376_v56 = vmax.f32 %v374_v52, %v375_v54 }
 0x24d   :  { %v368_v57 = vmax.f32 %v366_v53, %v367_v55 }
 0x24e   :  { %v377_v58 = vrot.slane %v376_v56, 1 }
 0x24f   :  { %v369_v59 = vrot.slane %v368_v57, 1 }
 0x250   :  { %v378_v60 = vmax.f32 %v376_v56, %v377_v58 }
 0x251   :  { %v370_v61 = vmax.f32 %v368_v57, %v369_v59 }
 0x253   :  { %v380_v62 = vsel %vm379_vm8, %v370_v61, %v378_v60 }
 0x254   :  { %593 = vmatmul.mubr.msk.f32.vlgmr.msra.gmra.mrb[2].mxu1 %vm363_vm7, %v380_v62 }
 0x327   :  { %v460_v1 = vpop.f32.mrb[2].mxu1 }
 0x328   :  { %v461_v2 = vadd.f32 %v527_v63, %v460_v1  ;;  %v594_v3 = vpop.f32.mrb[3].mxu1 }
 0x32a   :  { %v465_v4 = vsel %vm464_vm1, %v461_v2, -inf }
 0x32b   :  { %466 = vmax.xlane.f32.xlu1 %v465_v4 }
 0x3b8   :  { %v467_v5 = vpop.xlane.xlu1 %466 }
 0x3b9   :  { %v468_v6 = vsub.f32 %v461_v2, %v467_v5  ;;  %vm477_vm2 = vcmp.eq.f32.partialorder %v461_v2, %v467_v5 }
 0x3ba   :  { %v478_v7 = vsel %vm477_vm2, %v888_v0, 4 }
 0x3bb   :  { %v469_v9 = vmul.f32 1.442695, %v468_v6  ;;  %v479_v10 = vsel %vm464_vm1, %v478_v7, 2147483647 }
 0x3bc   :  { %v481_v11 = vshra.s32 %v479_v10, 16  ;;  %v480_v15 = vand.u32 65535, %v479_v10 }
 0x3bd   :  { %681 = vpow2.f32 %v469_v9 }
 0x3be   :  { %v483_v12 = vcvt.s32.f32 %v481_v11  ;;  %v482_v17 = vcvt.s32.f32 %v480_v15 }
 0x3c0   :  { %484 = vmin.xlane.f32.xlu0 %v483_v12 }
 0x3c7   :  { %v682_v13 = vpop.eup %681 }
 0x3c8   :  { %v471_v14 = vsel %vm464_vm1, %v682_v13, 0.0 }
 0x3c9   :  { %472 = vadd.xlane.f32.xlu1 %v471_v14 }
 0x44d   :  { %v485_v16 = vpop.xlane.xlu0 %484 }
 0x44e   :  { %vm486_vm11 = vcmp.eq.f32.partialorder %v483_v12, %v485_v16 }
 0x44f   :  { %v487_v18 = vsel %vm486_vm11, %v482_v17, inf }
 0x450   :  { %488 = vmin.xlane.f32.xlu0 %v487_v18 }
 0x456   :  { %v473_v19 = vpop.xlane.xlu1 %472 }
 0x457   :  { %683 = vrcp.f32 %v473_v19 }
 0x461   :  { %v684_v0 = vpop.eup %683 }
 0x462   :  { %v475_v20 = vmul.f32 %v684_v0, %v682_v13 }
 0x464   :  { %476 = vst.msk [vmem:[#allocation2] sm:$0x3] %vm464_vm1, %v475_v20 }
 0x465   :  { %696 = shalt.err (!%p693_p4)
}
 0x466   :  { %s697_s24 = scalar_lea.hbm %s1020_s6, 32 }
 0x467   :  { %p698_p5 = scmp.ne.s32.totalorder %s1020_s6, %s697_s24  ;;  %p701_p6 = scmp.lt.u32.totalorder %s697_s24, %s1020_s6 }
 0x469   :  { %p703_p7 = pnand %p701_p6, %p698_p5 }
 0x46b   :  { %706 = shalt.err (!%p703_p7)
}
 0x46c   :  { %505 = dma.vmem_to_hbm [thread:$0]  %s503_s0, 32, %s1020_s6, [#allocation3]   ;;  %v491_v21 = vcvt.f32.s32 %v485_v16  ;;  %vm494_vm10 = vcmask 1024  }
 0x46e   :  { %v492_v23 = vshll.u32 %v491_v21, 16 }
 0x4dd   :  { %v489_v22 = vpop.xlane.xlu0 %488 }
 0x4de   :  { %v490_v24 = vcvt.f32.s32 %v489_v22 }
 0x4e0   :  { %v493_v25 = vadd.s32 %v492_v23, %v490_v24 }
 0x4e2   :  { %495 = vst.msk [vmem:[%s1021_s7] sm:$0x3] %vm494_vm10, %v493_v25 }
 0x4e3   :  { %707 = dma.done.wait [#allocation3], 32  }
 0x4e4   :  { %708 = vsyncadd [#allocation3], 4294967264 }
 0x4e5   :  { %513 = vsyncpa [#allocation3], 1 }

</bundles_post_ra>
